<compile_context>
chip_gen: v7x
topology: tpu7x:2x2x1
jax: 0.10.0
libtpu: 0.0.40
codegen_flags: <defaults>
</compile_context>

<pallas_src>
import functools

import numpy as np
import jax
import jax.numpy as jnp
from jax.experimental import pallas as pl
from jax.experimental.pallas import tpu as pltpu


# ---------------------------------------------------------------------------
# Kernels
# ---------------------------------------------------------------------------
def _agg_transform_kernel(a_ref, x_ref, w_ref, b_ref, o_ref, acc_ref, *,
                          relu, tk, x_resident):
    """o[rows] = act( (sum_k A[rows,k] @ X[k]) @ W + b ).

    Aggregation-first is optimal on padded widths (f_in_pad == f_out_pad), and
    avoids any per-(i,k) recompute of the feature transform.
    """
    k = pl.program_id(1)

    @pl.when(k == 0)
    def _():
        acc_ref[...] = jnp.zeros_like(acc_ref)

    if x_resident:
        # X/H lives fully in VMEM (fetched once); slice the current K block.
        x_blk = x_ref[pl.ds(pl.multiple_of(k * tk, tk), tk), :]
    else:
        x_blk = x_ref[...]

    # bf16 MXU inputs, f32 accumulation.
    acc_ref[...] += jnp.dot(a_ref[...], x_blk,
                            preferred_element_type=jnp.float32)

    @pl.when(k == pl.num_programs(1) - 1)
    def _():
        agg = acc_ref[...].astype(jnp.bfloat16)
        y = jnp.dot(agg, w_ref[...], preferred_element_type=jnp.float32) + b_ref[...]
        if relu:
            y = jnp.maximum(y, 0.0)
        o_ref[...] = y.astype(o_ref.dtype)


def _fused_gcn_kernel(a_ref, x_ref, w1_ref, b1_ref, w2_ref, b2_ref, o_ref, h_ref):
    """Both GCN layers in one call; everything resident in VMEM (small graphs)."""
    ax = jnp.dot(a_ref[...], x_ref[...], preferred_element_type=jnp.float32)
    h = jnp.dot(ax.astype(jnp.bfloat16), w1_ref[...],
                preferred_element_type=jnp.float32) + b1_ref[...]
    h_ref[...] = jnp.maximum(h, 0.0).astype(jnp.bfloat16)

    ah = jnp.dot(a_ref[...], h_ref[...], preferred_element_type=jnp.float32)
    y = jnp.dot(ah.astype(jnp.bfloat16), w2_ref[...],
                preferred_element_type=jnp.float32) + b2_ref[...]
    o_ref[...] = y.astype(o_ref.dtype)


# ---------------------------------------------------------------------------
# pallas_call wrappers
# ---------------------------------------------------------------------------
def _gcn_conv(a_p, x_p, w_p, b_p, *, relu, out_dtype, tm, tk):
    """One GCNConv layer = one tiled pallas_call (large-graph path)."""
    n_pad = a_p.shape[0]
    f_in_pad = x_p.shape[1]
    f_out_pad = w_p.shape[1]
    grid = (n_pad // tm, n_pad // tk)

    # Keep X/H fully VMEM-resident when small so it is DMA'd once instead of
    # re-streamed for every row tile (cuts HBM bytes up to ~2x).
    x_resident = (n_pad * f_in_pad * 2) <= (8 << 20)
    if x_resident:
        x_spec = pl.BlockSpec((n_pad, f_in_pad), lambda i, k: (0, 0))
    else:
        x_spec = pl.BlockSpec((tk, f_in_pad), lambda i, k: (k, 0))

    x_stream = 1 if x_resident else grid[0]
    flops = 2 * n_pad * n_pad * f_in_pad + 2 * n_pad * f_in_pad * f_out_pad
    bytes_accessed = (a_p.size * 2 + x_p.size * 2 * x_stream + w_p.size * 2
                      + b_p.size * 4
                      + n_pad * f_out_pad * np.dtype(out_dtype).itemsize)

    return pl.pallas_call(
        functools.partial(_agg_transform_kernel, relu=relu, tk=tk,
                          x_resident=x_resident),
        out_shape=jax.ShapeDtypeStruct((n_pad, f_out_pad), out_dtype),
        grid_spec=pltpu.PrefetchScalarGridSpec(
            num_scalar_prefetch=0,
            grid=grid,
            in_specs=[
                pl.BlockSpec((tm, tk), lambda i, k: (i, k)),               # A_hat tile
                x_spec,                                                    # X / H
                pl.BlockSpec((f_in_pad, f_out_pad), lambda i, k: (0, 0)),  # W (resident)
                pl.BlockSpec((1, f_out_pad), lambda i, k: (0, 0)),         # bias
            ],
            out_specs=pl.BlockSpec((tm, f_out_pad), lambda i, k: (i, 0)),
            scratch_shapes=[pltpu.VMEM((tm, f_in_pad), jnp.float32)],
        ),
        compiler_params=pltpu.CompilerParams(
            # Row axis shards across TensorCores (v7x megacore); K is reduction.
            dimension_semantics=("parallel", "arbitrary"),
        ),
        cost_estimate=pl.CostEstimate(
            flops=flops, transcendentals=0, bytes_accessed=bytes_accessed),
    )(a_p, x_p, w_p, b_p)


def _gcn_fused(a_p, x_p, w1_p, b1_p, w2_p, b2_p, out_dtype):
    """Both layers in one launch (small-graph path, everything VMEM-resident)."""
    n_pad = a_p.shape[0]
    f_pad = x_p.shape[1]
    h_pad = w1_p.shape[1]
    t_pad = w2_p.shape[1]

    flops = (2 * n_pad * n_pad * (f_pad + h_pad)
             + 2 * n_pad * (f_pad * h_pad + h_pad * t_pad))
    bytes_accessed = ((a_p.size + x_p.size + w1_p.size + w2_p.size) * 2
                      + (b1_p.size + b2_p.size) * 4
                      + n_pad * t_pad * np.dtype(out_dtype).itemsize)

    return pl.pallas_call(
        _fused_gcn_kernel,
        out_shape=jax.ShapeDtypeStruct((n_pad, t_pad), out_dtype),
        grid_spec=pltpu.PrefetchScalarGridSpec(
            num_scalar_prefetch=0,
            grid=(1,),
            in_specs=[
                pl.BlockSpec((n_pad, n_pad), lambda i: (0, 0)),   # A_hat
                pl.BlockSpec((n_pad, f_pad), lambda i: (0, 0)),   # X
                pl.BlockSpec((f_pad, h_pad), lambda i: (0, 0)),   # W1
                pl.BlockSpec((1, h_pad), lambda i: (0, 0)),       # b1
                pl.BlockSpec((h_pad, t_pad), lambda i: (0, 0)),   # W2
                pl.BlockSpec((1, t_pad), lambda i: (0, 0)),       # b2
            ],
            out_specs=pl.BlockSpec((n_pad, t_pad), lambda i: (0, 0)),
            scratch_shapes=[pltpu.VMEM((n_pad, h_pad), jnp.bfloat16)],  # H stays on-chip
        ),
        compiler_params=pltpu.CompilerParams(
            dimension_semantics=("arbitrary",),
        ),
        cost_estimate=pl.CostEstimate(
            flops=flops, transcendentals=0, bytes_accessed=bytes_accessed),
    )(a_p, x_p, w1_p, b1_p, w2_p, b2_p)


# ---------------------------------------------------------------------------
# Glue: normalized adjacency, padding, forward
# ---------------------------------------------------------------------------
def _round_up(v, m):
    return ((v + m - 1) // m) * m


def _pad2d(x, rows, cols):
    return jnp.pad(x, ((0, rows - x.shape[0]), (0, cols - x.shape[1])))


def build_normalized_adjacency(edge_index, num_nodes):
    """Dense A_hat = D^{-1/2}(A + I)D^{-1/2} from COO edge_index (2, E)."""
    src, dst = edge_index[0], edge_index[1]
    a = jnp.zeros((num_nodes, num_nodes), jnp.float32)
    # Scatter-add so duplicate edges accumulate like PyG's scatter.
    a = a.at[dst, src].add(1.0)
    # add_self_loops=True: add a weight-1 self loop unconditionally (A + I).
    rng = jnp.arange(num_nodes)
    a = a.at[rng, rng].add(1.0)
    deg = jnp.sum(a, axis=1)
    dinv_sqrt = jnp.where(deg > 0, jax.lax.rsqrt(jnp.maximum(deg, 1e-12)), 0.0)
    # Normalization + bf16 cast fuse into one elementwise pass under XLA.
    return dinv_sqrt[:, None] * a * dinv_sqrt[None, :]


def gcn_forward(x, edge_index, w1, b1, w2, b2, *, tile=512, fused_max_n_pad=1024):
    n, f_in = x.shape
    hid = w1.shape[1]
    t = w2.shape[1]

    a_hat = build_normalized_adjacency(edge_index, n)

    # Lane-dense / tile-aligned padding; bf16 MXU inputs.
    if n <= fused_max_n_pad:
        n_pad = _round_up(n, 128)
    else:
        n_pad = _round_up(n, tile)
    f_pad = _round_up(f_in, 128)
    h_pad = _round_up(hid, 128)
    t_pad = _round_up(t, 128)

    a_p = _pad2d(a_hat, n_pad, n_pad).astype(jnp.bfloat16)
    x_p = _pad2d(x, n_pad, f_pad).astype(jnp.bfloat16)
    w1_p = _pad2d(w1, f_pad, h_pad).astype(jnp.bfloat16)
    b1_p = _pad2d(b1, 1, h_pad).astype(jnp.float32)
    w2_p = _pad2d(w2, h_pad, t_pad).astype(jnp.bfloat16)
    b2_p = _pad2d(b2, 1, t_pad).astype(jnp.float32)

    if n_pad <= fused_max_n_pad:
        # Tiny-problem regime: one launch, A resident, H never leaves VMEM.
        y = _gcn_fused(a_p, x_p, w1_p, b1_p, w2_p, b2_p, jnp.float32)
    else:
        tm = tk = min(tile, n_pad)
        # Both layers agg-first: on padded widths f_in_pad == f_out_pad == 128,
        # so agg-first is never worse and avoids per-row-tile transform recompute.
        h = _gcn_conv(a_p, x_p, w1_p, b1_p, relu=True,
                      out_dtype=jnp.bfloat16, tm=tm, tk=tk)
        y = _gcn_conv(a_p, h, w2_p, b2_p, relu=False,
                      out_dtype=jnp.float32, tm=tm, tk=tk)

    return y[:n, :t].flatten()


# ---------------------------------------------------------------------------
# References
# ---------------------------------------------------------------------------
def reference_forward_bf16(x, edge_index, w1, b1, w2, b2):
    """Pure-JAX reference mimicking the kernel's bf16-input / f32-accumulate math."""
    a = build_normalized_adjacency(edge_index, x.shape[0]).astype(jnp.bfloat16)
    xb = x.astype(jnp.bfloat16)
    w1b = w1.astype(jnp.bfloat16)
    w2b = w2.astype(jnp.bfloat16)
    ax = jnp.dot(a, xb, preferred_element_type=jnp.float32).astype(jnp.bfloat16)
    h = jnp.maximum(jnp.dot(ax, w1b, preferred_element_type=jnp.float32) + b1, 0.0)
    hb = h.astype(jnp.bfloat16)
    ah = jnp.dot(a, hb, preferred_element_type=jnp.float32).astype(jnp.bfloat16)
    y = jnp.dot(ah, w2b, preferred_element_type=jnp.float32) + b2
    return y.flatten()


def reference_forward_f32(x, edge_index, w1, b1, w2, b2):
    """Full-precision semantic reference (original module math)."""
    a = build_normalized_adjacency(edge_index, x.shape[0])
    h = jnp.maximum(a @ (x @ w1) + b1, 0.0)
    y = a @ (h @ w2) + b2
    return y.flatten()


def _ring_edges(n):
    idx = jnp.arange(n, dtype=jnp.int32)
    nxt = (idx + 1) % n
    return jnp.stack([jnp.concatenate([idx, nxt]),
                      jnp.concatenate([nxt, idx])], axis=0)


if __name__ == "__main__":
    # ---- Small deterministic problem (fused single-launch path) ----
    N, F_IN, HID, T = 8, 4, 32, 1

    key = jax.random.PRNGKey(0)
    k_x, k_w1, k_w2, k_x2 = jax.random.split(key, 4)

    x = jax.random.normal(k_x, (N, F_IN), jnp.float32)
    edge_index = _ring_edges(N)

    w1 = jax.random.normal(k_w1, (F_IN, HID), jnp.float32) * (1.0 / jnp.sqrt(F_IN))
    b1 = jnp.zeros((1, HID), jnp.float32)
    w2 = jax.random.normal(k_w2, (HID, T), jnp.float32) * (1.0 / jnp.sqrt(HID))
    b2 = jnp.zeros((1, T), jnp.float32)

    # TODO(synk): dropout is a no-op in the reference forward (p=0 / commented
    # out), so it is intentionally not implemented.

    out = jax.block_until_ready(gcn_forward(x, edge_index, w1, b1, w2, b2))
    ref_bf16 = reference_forward_bf16(x, edge_index, w1, b1, w2, b2)
    ref_f32 = reference_forward_f32(x, edge_index, w1, b1, w2, b2)

    assert out.shape == (N * T,), out.shape
    assert jnp.allclose(out, ref_bf16, atol=1e-3, rtol=1e-3), (out, ref_bf16)
    assert jnp.max(jnp.abs(out - ref_f32)) < 5e-2, (out, ref_f32)

    # ---- Larger graph exercising the tiled (512x512, resident-X) path ----
    N2 = 1100   # pads to 1536 -> grid (3, 3), non-fused path
    x2 = jax.random.normal(k_x2, (N2, F_IN), jnp.float32)
    edge_index2 = _ring_edges(N2)

    out2 = jax.block_until_ready(gcn_forward(x2, edge_index2, w1, b1, w2, b2))
    ref2_bf16 = reference_forward_bf16(x2, edge_index2, w1, b1, w2, b2)
    ref2_f32 = reference_forward_f32(x2, edge_index2, w1, b1, w2, b2)

    assert out2.shape == (N2 * T,), out2.shape
    assert jnp.allclose(out2, ref2_bf16, atol=1e-2, rtol=1e-2), (out2, ref2_bf16)
    rel_err = jnp.linalg.norm(out2 - ref2_f32) / (jnp.linalg.norm(ref2_f32) + 1e-12)
    assert rel_err < 3e-2, rel_err

    print("KERNEL_OK")
</pallas_src>

<mosaic_0001>
module attributes {stable_mosaic.version = 11 : i64} {
  func.func @_fused_gcn_kernel(%arg0: i32, %arg1: memref<128x128xbf16, #tpu.memory_space<vmem>>, %arg2: memref<128x128xbf16, #tpu.memory_space<vmem>>, %arg3: memref<128x128xbf16, #tpu.memory_space<vmem>>, %arg4: memref<1x128xf32, #tpu.memory_space<vmem>>, %arg5: memref<128x128xbf16, #tpu.memory_space<vmem>>, %arg6: memref<1x128xf32, #tpu.memory_space<vmem>>, %arg7: memref<128x128xf32, #tpu.memory_space<vmem>>, %arg8: memref<128x128xbf16, #tpu.memory_space<vmem>>) attributes {dimension_semantics = [#tpu.dimension_semantics<arbitrary>], iteration_bounds = array<i64: 1>, scalar_prefetch = 0 : i64, scratch_operands = 1 : i64, tpu.core_type = #tpu.core_type<tc>, window_params = [{pipeline_mode = #tpu.pipeline_mode<synchronous>, transform_indices = @transform_0, window_bounds = array<i64: 128, 128>}, {pipeline_mode = #tpu.pipeline_mode<synchronous>, transform_indices = @transform_1, window_bounds = array<i64: 128, 128>}, {pipeline_mode = #tpu.pipeline_mode<synchronous>, transform_indices = @transform_2, window_bounds = array<i64: 128, 128>}, {pipeline_mode = #tpu.pipeline_mode<synchronous>, transform_indices = @transform_3, window_bounds = array<i64: 1, 128>}, {pipeline_mode = #tpu.pipeline_mode<synchronous>, transform_indices = @transform_4, window_bounds = array<i64: 128, 128>}, {pipeline_mode = #tpu.pipeline_mode<synchronous>, transform_indices = @transform_5, window_bounds = array<i64: 1, 128>}, {pipeline_mode = #tpu.pipeline_mode<synchronous>, transform_indices = @transform_6, window_bounds = array<i64: 128, 128>}]} {
    %c0 = arith.constant 0 : index
    %c0_0 = arith.constant 0 : index
    %0 = vector.load %arg1[%c0, %c0_0] : memref<128x128xbf16, #tpu.memory_space<vmem>>, vector<128x128xbf16>
    %c0_1 = arith.constant 0 : index
    %c0_2 = arith.constant 0 : index
    %1 = vector.load %arg2[%c0_1, %c0_2] : memref<128x128xbf16, #tpu.memory_space<vmem>>, vector<128x128xbf16>
    %cst = arith.constant dense<0.000000e+00> : vector<128x128xf32>
    %2 = tpu.matmul %0, %1, %cst {dimension_numbers = #tpu.dot_dimension_numbers<[1], [0], [0], [1], [0, 0, 1, 1], [], []>} : vector<128x128xbf16>, vector<128x128xbf16>, vector<128x128xf32> -> vector<128x128xf32>
    %3 = arith.truncf %2 : vector<128x128xf32> to vector<128x128xbf16>
    %c0_3 = arith.constant 0 : index
    %c0_4 = arith.constant 0 : index
    %4 = vector.load %arg3[%c0_3, %c0_4] : memref<128x128xbf16, #tpu.memory_space<vmem>>, vector<128x128xbf16>
    %cst_5 = arith.constant dense<0.000000e+00> : vector<128x128xf32>
    %5 = tpu.matmul %3, %4, %cst_5 {dimension_numbers = #tpu.dot_dimension_numbers<[1], [0], [0], [1], [0, 0, 1, 1], [], []>} : vector<128x128xbf16>, vector<128x128xbf16>, vector<128x128xf32> -> vector<128x128xf32>
    %c0_6 = arith.constant 0 : index
    %c0_7 = arith.constant 0 : index
    %6 = vector.load %arg4[%c0_6, %c0_7] : memref<1x128xf32, #tpu.memory_space<vmem>>, vector<1x128xf32>
    %7 = vector.broadcast %6 : vector<1x128xf32> to vector<128x128xf32>
    %8 = arith.addf %5, %7 : vector<128x128xf32>
    %cst_8 = arith.constant 0.000000e+00 : f32
    %9 = vector.broadcast %cst_8 : f32 to vector<128x128xf32>
    %10 = arith.maximumf %8, %9 : vector<128x128xf32>
    %11 = arith.truncf %10 : vector<128x128xf32> to vector<128x128xbf16>
    %c0_9 = arith.constant 0 : index
    %c0_10 = arith.constant 0 : index
    %12 = vector.load %arg8[%c0_9, %c0_10] : memref<128x128xbf16, #tpu.memory_space<vmem>>, vector<128x128xbf16>
    tpu.vector_store %arg8[%c0_9, %c0_10], %11 {strides = array<i32>} : memref<128x128xbf16, #tpu.memory_space<vmem>>, vector<128x128xbf16>,
    %c0_11 = arith.constant 0 : index
    %c0_12 = arith.constant 0 : index
    %13 = vector.load %arg1[%c0_11, %c0_12] : memref<128x128xbf16, #tpu.memory_space<vmem>>, vector<128x128xbf16>
    %c0_13 = arith.constant 0 : index
    %c0_14 = arith.constant 0 : index
    %14 = vector.load %arg8[%c0_13, %c0_14] : memref<128x128xbf16, #tpu.memory_space<vmem>>, vector<128x128xbf16>
    %cst_15 = arith.constant dense<0.000000e+00> : vector<128x128xf32>
    %15 = tpu.matmul %13, %14, %cst_15 {dimension_numbers = #tpu.dot_dimension_numbers<[1], [0], [0], [1], [0, 0, 1, 1], [], []>} : vector<128x128xbf16>, vector<128x128xbf16>, vector<128x128xf32> -> vector<128x128xf32>
    %16 = arith.truncf %15 : vector<128x128xf32> to vector<128x128xbf16>
    %c0_16 = arith.constant 0 : index
    %c0_17 = arith.constant 0 : index
    %17 = vector.load %arg5[%c0_16, %c0_17] : memref<128x128xbf16, #tpu.memory_space<vmem>>, vector<128x128xbf16>
    %cst_18 = arith.constant dense<0.000000e+00> : vector<128x128xf32>
    %18 = tpu.matmul %16, %17, %cst_18 {dimension_numbers = #tpu.dot_dimension_numbers<[1], [0], [0], [1], [0, 0, 1, 1], [], []>} : vector<128x128xbf16>, vector<128x128xbf16>, vector<128x128xf32> -> vector<128x128xf32>
    %c0_19 = arith.constant 0 : index
    %c0_20 = arith.constant 0 : index
    %19 = vector.load %arg6[%c0_19, %c0_20] : memref<1x128xf32, #tpu.memory_space<vmem>>, vector<1x128xf32>
    %20 = vector.broadcast %19 : vector<1x128xf32> to vector<128x128xf32>
    %21 = arith.addf %18, %20 : vector<128x128xf32>
    %c0_21 = arith.constant 0 : index
    %c0_22 = arith.constant 0 : index
    %22 = vector.load %arg7[%c0_21, %c0_22] : memref<128x128xf32, #tpu.memory_space<vmem>>, vector<128x128xf32>
    tpu.vector_store %arg7[%c0_21, %c0_22], %21 {strides = array<i32>} : memref<128x128xf32, #tpu.memory_space<vmem>>, vector<128x128xf32>,
    return
  }
  func.func @transform_0(%arg0: i32) -> (i32, i32) {
    %c0_i32 = arith.constant 0 : i32
    %c0_i32_0 = arith.constant 0 : i32
    %c0_i32_1 = arith.constant 0 : i32
    return %c0_i32, %c0_i32_0 : i32, i32
  }
  func.func @transform_1(%arg0: i32) -> (i32, i32) {
    %c0_i32 = arith.constant 0 : i32
    %c0_i32_0 = arith.constant 0 : i32
    %c0_i32_1 = arith.constant 0 : i32
    return %c0_i32, %c0_i32_0 : i32, i32
  }
  func.func @transform_2(%arg0: i32) -> (i32, i32) {
    %c0_i32 = arith.constant 0 : i32
    %c0_i32_0 = arith.constant 0 : i32
    %c0_i32_1 = arith.constant 0 : i32
    return %c0_i32, %c0_i32_0 : i32, i32
  }
  func.func @transform_3(%arg0: i32) -> (i32, i32) {
    %c0_i32 = arith.constant 0 : i32
    %c0_i32_0 = arith.constant 0 : i32
    %c0_i32_1 = arith.constant 0 : i32
    return %c0_i32, %c0_i32_0 : i32, i32
  }
  func.func @transform_4(%arg0: i32) -> (i32, i32) {
    %c0_i32 = arith.constant 0 : i32
    %c0_i32_0 = arith.constant 0 : i32
    %c0_i32_1 = arith.constant 0 : i32
    return %c0_i32, %c0_i32_0 : i32, i32
  }
  func.func @transform_5(%arg0: i32) -> (i32, i32) {
    %c0_i32 = arith.constant 0 : i32
    %c0_i32_0 = arith.constant 0 : i32
    %c0_i32_1 = arith.constant 0 : i32
    return %c0_i32, %c0_i32_0 : i32, i32
  }
  func.func @transform_6(%arg0: i32) -> (i32, i32) {
    %c0_i32 = arith.constant 0 : i32
    %c0_i32_0 = arith.constant 0 : i32
    %c0_i32_1 = arith.constant 0 : i32
    return %c0_i32, %c0_i32_0 : i32, i32
  }
}

</mosaic_0001>

<bundles_post_ra>
// kernel: tpu_custom_call.1
= control target key start
LH: loop header
LB: loop body
LE: loop exit
PB: predicated region body
PF: predicated region fallthrough
CT: control target
= control target key end

     0   :  { %11 = vsyncpa [#allocation4], 0  ;;  %s1430_s0 = inlined_call_operand.hbm [shape: bf16[128,128], index: 0, kind: input, shape index: {}]   ;;  %s1431_s1 = inlined_call_operand.hbm [shape: bf16[128,128], index: 1, kind: input, shape index: {}]   ;;  %s1432_s2 = inlined_call_operand.hbm [shape: bf16[128,128], index: 2, kind: input, shape index: {}]   ;;  %s1433_s3 = inlined_call_operand.vmem [shape: f32[1,128], index: 3, kind: input, shape index: {}]   ;;  %s1434_s4 = inlined_call_operand.hbm [shape: bf16[128,128], index: 4, kind: input, shape index: {}]   ;;  %s1435_s5 = inlined_call_operand.vmem [shape: f32[1,128], index: 5, kind: input, shape index: {}]   ;;  %s1436_s6 = inlined_call_operand.hbm [shape: f32[128,128], index: 6, kind: output, shape index: {}]  }
   0x1   :  { %12 = vsyncpa [#allocation7], 0 }
   0x2   :  { %13 = vsyncpa [#allocation10], 0 }
   0x3   :  { %14 = vsyncpa [#allocation5], 0  ;;  %s1294_s21 = smov [#allocation6]   ;;  %s1295_s23 = smov [#allocation3]  }
   0x4   :  { %s32_s22 = sshll.u32 %s1294_s21, 4  ;;  %s20_s24 = sshll.u32 %s1295_s23, 4  ;;  %s33_s22 = int_to_ptr.vmem [resolvable:$true] %s32_s22  ;;  %s1338_s24 = int_to_ptr.vmem [resolvable:$true] %s20_s24 }
   0x5   :  { %s1176_s27 = scalar_lea.hbm %s1431_s1, 1024 }
   0x6   :  { %p1177_p0 = scmp.ne.s32.totalorder %s1431_s1, %s1176_s27  ;;  %p1180_p1 = scmp.lt.u32.totalorder %s1176_s27, %s1431_s1 }
   0x8   :  { %p1182_p2 = pnand %p1180_p1, %p1177_p0 }
   0xa   :  { %1185 = shalt.err (!%p1182_p2)
}
   0xb   :  { %s1186_s8 = scalar_lea.vmem %s33_s22, 1024  ;;  %p1191_p4 = scmp.lt.s32.totalorder %s33_s22, %s33_s22 }
   0xc   :  { %p1187_p3 = scmp.ne.s32.totalorder %s33_s22, %s1186_s8  ;;  %p1192_p5 = scmp.lt.s32.totalorder %s1186_s8, %s1186_s8 }
   0xe   :  { %p1193_p6 = por %p1192_p5, %p1191_p4 }
  0x10   :  { %p1194_p7 = pnand %p1193_p6, %p1187_p3 }
  0x12   :  { %1197 = shalt.err (!%p1194_p7)
}
  0x13   :  { %s1296_s9 = smov 64   ;;  %s1297_s10 = smov 4  }
  0x14   :  { %38 = dma.hbm_to_vmem [thread:$0]  %s1431_s1, 1024, %s33_s22, [#allocation7], %s1296_s9, %s1296_s9, %s1297_s10  }
  0x15   :  { %s1198_s15 = scalar_lea.hbm %s1430_s0, 1024 }
  0x16   :  { %p1199_p8 = scmp.ne.s32.totalorder %s1430_s0, %s1198_s15  ;;  %p1202_p9 = scmp.lt.u32.totalorder %s1198_s15, %s1430_s0 }
  0x18   :  { %p1204_p10 = pnand %p1202_p9, %p1199_p8 }
  0x1a   :  { %1207 = shalt.err (!%p1204_p10)
}
  0x1b   :  { %s1208_s20 = scalar_lea.vmem %s1338_s24, 1024  ;;  %p1213_p12 = scmp.lt.s32.totalorder %s1338_s24, %s1338_s24 }
  0x1c   :  { %p1209_p11 = scmp.ne.s32.totalorder %s1338_s24, %s1208_s20  ;;  %p1214_p13 = scmp.lt.s32.totalorder %s1208_s20, %s1208_s20 }
  0x1e   :  { %p1215_p0 = por %p1214_p13, %p1213_p12 }
  0x20   :  { %p1216_p1 = pnand %p1215_p0, %p1209_p11 }
  0x22   :  { %1219 = shalt.err (!%p1216_p1)
}
  0x23   :  { %26 = dma.hbm_to_vmem [thread:$0]  %s1430_s0, 1024, %s1338_s24, [#allocation4], %s1296_s9, %s1296_s9, %s1297_s10  }
  0x24   :  { %s1298_s22 = smov [#allocation8]   ;;  %s1299_s25 = smov [#allocation9]  }
  0x25   :  { %s44_s23 = sshll.u32 %s1298_s22, 4  ;;  %s58_s26 = sshll.u32 %s1299_s25, 4  ;;  %s45_s23 = int_to_ptr.vmem [resolvable:$true] %s44_s23  ;;  %s1375_s26 = int_to_ptr.vmem [resolvable:$true] %s58_s26 }
  0x26   :  { %s1220_s29 = scalar_lea.hbm %s1432_s2, 1024 }
  0x27   :  { %p1221_p2 = scmp.ne.s32.totalorder %s1432_s2, %s1220_s29  ;;  %p1224_p3 = scmp.lt.u32.totalorder %s1220_s29, %s1432_s2 }
  0x29   :  { %p1226_p4 = pnand %p1224_p3, %p1221_p2 }
  0x2b   :  { %1229 = shalt.err (!%p1226_p4)
}
  0x2c   :  { %s1230_s0 = scalar_lea.vmem %s45_s23, 1024  ;;  %p1235_p6 = scmp.lt.s32.totalorder %s45_s23, %s45_s23 }
  0x2d   :  { %p1231_p5 = scmp.ne.s32.totalorder %s45_s23, %s1230_s0  ;;  %p1236_p7 = scmp.lt.s32.totalorder %s1230_s0, %s1230_s0 }
  0x2f   :  { %p1237_p8 = por %p1236_p7, %p1235_p6 }
  0x31   :  { %p1238_p9 = pnand %p1237_p8, %p1231_p5 }
  0x33   :  { %1241 = shalt.err (!%p1238_p9)
}
  0x34   :  { %50 = dma.hbm_to_vmem [thread:$0]  %s1432_s2, 1024, %s45_s23, [#allocation7], %s1296_s9, %s1296_s9, %s1297_s10  }
  0x35   :  { %s1242_s15 = scalar_lea.hbm %s1434_s4, 1024 }
  0x36   :  { %p1243_p10 = scmp.ne.s32.totalorder %s1434_s4, %s1242_s15  ;;  %p1246_p11 = scmp.lt.u32.totalorder %s1242_s15, %s1434_s4 }
  0x38   :  { %p1248_p12 = pnand %p1246_p11, %p1243_p10 }
  0x3a   :  { %1251 = shalt.err (!%p1248_p12)
}
  0x3b   :  { %s1252_s20 = scalar_lea.vmem %s1375_s26, 1024  ;;  %p1257_p0 = scmp.lt.s32.totalorder %s1375_s26, %s1375_s26 }
  0x3c   :  { %p1253_p13 = scmp.ne.s32.totalorder %s1375_s26, %s1252_s20  ;;  %p1258_p1 = scmp.lt.s32.totalorder %s1252_s20, %s1252_s20 }
  0x3e   :  { %p1259_p2 = por %p1258_p1, %p1257_p0 }
  0x40   :  { %p1260_p3 = pnand %p1259_p2, %p1253_p13 }
  0x42   :  { %1263 = shalt.err (!%p1260_p3)
}
  0x43   :  { %64 = dma.hbm_to_vmem [thread:$0]  %s1434_s4, 1024, %s1375_s26, [#allocation10], %s1296_s9, %s1296_s9, %s1297_s10  }
  0x44   :  { %1286 = dma.done.wait [#allocation4], 1024  }
  0x45   :  { %1287 = vsyncadd [#allocation4], 4294966272 }
  0x46   :  { %1288 = dma.done.wait [#allocation7], 2048  }
  0x47   :  { %1289 = vsyncadd [#allocation7], 4294965248 }
  0x48   :  { %1290 = dma.done.wait [#allocation10], 1024  }
  0x49   :  { %1291 = vsyncadd [#allocation10], 4294966272  ;;  %v1136_v0 = vld [vmem:[#allocation6] sm:$0xff]   ;;  %v1137_v1 = vld [vmem:[#allocation6 + $0x8] sm:$0xff]  }
  0x4a   :  { %999 = vmatprep.subr.bf16.mxu0 %v1136_v0  ;;  %v1138_v2 = vld [vmem:[#allocation6 + $0x10] sm:$0xff]   ;;  %v1139_v3 = vld [vmem:[#allocation6 + $0x18] sm:$0xff]   ;;  %v1144_v4 = vld [vmem:[#allocation3] sm:$0xff]  }
  0x4b   :  { %1000 = vmatpush3.bf16.msra.mxu0 %v1136_v0  ;;  %1015 = vmatprep.mubr.bf16.mxu0 %v1144_v4  ;;  %v1140_v5 = vld [vmem:[#allocation6 + $0x20] sm:$0xff]   ;;  %v1141_v6 = vld [vmem:[#allocation6 + $0x28] sm:$0xff]   ;;  %v1142_v9 = vld [vmem:[#allocation6 + $0x30] sm:$0xff]  }
  0x4c   :  { %1001 = vmatprep.subr.bf16.mxu0 %v1137_v1  ;;  %v1152_v7 = vld [vmem:[#allocation8] sm:$0xff]   ;;  %v1153_v8 = vld [vmem:[#allocation8 + $0x8] sm:$0xff]   ;;  %v1154_v10 = vld [vmem:[#allocation8 + $0x10] sm:$0xff]  }
  0x4d   :  { %1031 = vmatprep.subr.bf16.mxu1 %v1152_v7  ;;  %v1143_v11 = vld [vmem:[#allocation6 + $0x38] sm:$0xff]   ;;  %v1156_v13 = vld [vmem:[#allocation8 + $0x20] sm:$0xff]   ;;  %v1145_v14 = vld [vmem:[#allocation3 + $0x8] sm:$0xff]  }
  0x4e   :  { %1032 = vmatpush3.bf16.msra.mxu1 %v1152_v7  ;;  %v1155_v12 = vld [vmem:[#allocation8 + $0x18] sm:$0xff]   ;;  %v1146_v15 = vld [vmem:[#allocation3 + $0x10] sm:$0xff]   ;;  %v1157_v16 = vld [vmem:[#allocation8 + $0x28] sm:$0xff]  }
  0x4f   :  { %1002 = vmatpush3.bf16.msra.mxu0 %v1137_v1  ;;  %1033 = vmatprep.subr.bf16.mxu1 %v1153_v8  ;;  %v1158_v17 = vld [vmem:[#allocation8 + $0x30] sm:$0xff]   ;;  %v1147_v18 = vld [vmem:[#allocation3 + $0x18] sm:$0xff]   ;;  %v1148_v19 = vld [vmem:[#allocation3 + $0x20] sm:$0xff]  }
  0x50   :  { %1003 = vmatprep.subr.bf16.mxu0 %v1138_v2  ;;  %v1149_v20 = vld [vmem:[#allocation3 + $0x28] sm:$0xff]   ;;  %v1150_v21 = vld [vmem:[#allocation3 + $0x30] sm:$0xff]   ;;  %v1151_v22 = vld [vmem:[#allocation3 + $0x38] sm:$0xff]  }
  0x51   :  { %v1159_v23 = vld [vmem:[#allocation8 + $0x38] sm:$0xff]   ;;  %v1160_v48 = vld [vmem:[#allocation3] sm:$0xff]   ;;  %v1169_v50 = vld [vmem:[#allocation9 + $0x8] sm:$0xff]  }
  0x52   :  { %1034 = vmatpush3.bf16.msra.mxu1 %v1153_v8  ;;  %v1168_v49 = vld [vmem:[#allocation9] sm:$0xff]   ;;  %v1170_v51 = vld [vmem:[#allocation9 + $0x10] sm:$0xff]   ;;  %v1171_v52 = vld [vmem:[#allocation9 + $0x18] sm:$0xff]  }
  0x53   :  { %1004 = vmatpush3.bf16.msra.mxu0 %v1138_v2  ;;  %1035 = vmatprep.subr.bf16.mxu1 %v1154_v10  ;;  %v1172_v53 = vld [vmem:[#allocation9 + $0x20] sm:$0xff]   ;;  %v1173_v54 = vld [vmem:[#allocation9 + $0x28] sm:$0xff]   ;;  %v1174_v55 = vld [vmem:[#allocation9 + $0x30] sm:$0xff]  }
  0x54   :  { %1005 = vmatprep.subr.bf16.mxu0 %v1139_v3  ;;  %v909_v56 = vld [vmem:[%s1433_s3] ss:$0 sm:$0xff] }
  0x56   :  { %1036 = vmatpush3.bf16.msra.mxu1 %v1154_v10 }
  0x57   :  { %1006 = vmatpush3.bf16.msra.mxu0 %v1139_v3  ;;  %1037 = vmatprep.subr.bf16.mxu1 %v1155_v12 }
  0x58   :  { %1007 = vmatprep.subr.bf16.mxu0 %v1140_v5 }
  0x5a   :  { %1038 = vmatpush3.bf16.msra.mxu1 %v1155_v12 }
  0x5b   :  { %1008 = vmatpush3.bf16.msra.mxu0 %v1140_v5  ;;  %1039 = vmatprep.subr.bf16.mxu1 %v1156_v13 }
  0x5c   :  { %1009 = vmatprep.subr.bf16.mxu0 %v1141_v6 }
  0x5e   :  { %1040 = vmatpush3.bf16.msra.mxu1 %v1156_v13 }
  0x5f   :  { %1010 = vmatpush3.bf16.msra.mxu0 %v1141_v6  ;;  %1041 = vmatprep.subr.bf16.mxu1 %v1157_v16 }
  0x60   :  { %1011 = vmatprep.subr.bf16.mxu0 %v1142_v9 }
  0x62   :  { %1042 = vmatpush3.bf16.msra.mxu1 %v1157_v16 }
  0x63   :  { %1012 = vmatpush3.bf16.msra.mxu0 %v1142_v9  ;;  %1043 = vmatprep.subr.bf16.mxu1 %v1158_v17 }
  0x64   :  { %1013 = vmatprep.subr.bf16.mxu0 %v1143_v11 }
  0x66   :  { %1044 = vmatpush3.bf16.msra.mxu1 %v1158_v17 }
  0x67   :  { %1014 = vmatpush3.bf16.msra.mxu0 %v1143_v11  ;;  %1045 = vmatprep.subr.bf16.mxu1 %v1159_v23 }
  0x6a   :  { %1016 = vmatmul.mubr.bf16.vlgmr.msra.gmra.mrb[0].mxu0 %v1145_v14  ;;  %1046 = vmatpush3.bf16.msra.mxu1 %v1159_v23 }
  0x6b   :  { %1019 = vmatprep.mubr.bf16.mxu0 %v1146_v15  ;;  %1095 = vmatprep.subr.bf16.mxu1 %v1168_v49 }
  0x72   :  { %1020 = vmatmul.mubr.bf16.gmra.mrb[4].mxu0 %v1147_v18 }
  0x73   :  { %1023 = vmatprep.mubr.bf16.mxu0 %v1148_v19 }
  0x7a   :  { %1024 = vmatmul.mubr.bf16.gmra.mrb[8].mxu0 %v1149_v20 }
  0x7b   :  { %1027 = vmatprep.mubr.bf16.mxu0 %v1150_v21 }
  0x82   :  { %1028 = vmatmul.mubr.bf16.gmra.mrb[12].mxu0 %v1151_v22 }
  0x83   :  { %1079 = vmatprep.mubr.bf16.mxu0 %v1160_v48 }
 0x13d   :  { %v1017_v24 = vpop.f32.mrb[0].mxu0 }
 0x13e   :  { %v242_v25 = vpop.f32.mrb[1].mxu0 }
 0x13f   :  { %v1018_v26 = vpop.f32.mrb[2].mxu0 }
 0x140   :  { %v306_v27 = vpack.c.bf16 %v1018_v26, %v1017_v24  ;;  %v245_v28 = vpop.f32.mrb[3].mxu0 }
 0x141   :  { %v305_v29 = vpack.c.bf16 %v245_v28, %v242_v25 }
 0x143   :  { %1047 = vmatprep.mubr.bf16.mxu1 %v305_v29 }
 0x144   :  { %1048 = vmatmul.mubr.bf16.vlgmr.msra.gmra.mrb[0].mxu1 %v306_v27 }
 0x145   :  { %v1021_v30 = vpop.f32.mrb[4].mxu0  ;;  %1096 = vmatpush3.bf16.msra.mxu1 %v1168_v49  ;;  %v1161_v49 = vld [vmem:[#allocation3 + $0x8] sm:$0xff]  }
 0x146   :  { %v258_v31 = vpop.f32.mrb[5].mxu0  ;;  %1097 = vmatprep.subr.bf16.mxu1 %v1169_v50 }
 0x147   :  { %v1022_v32 = vpop.f32.mrb[6].mxu0 }
 0x148   :  { %v308_v33 = vpack.c.bf16 %v1022_v32, %v1021_v30  ;;  %v261_v34 = vpop.f32.mrb[7].mxu0 }
 0x149   :  { %v307_v35 = vpack.c.bf16 %v261_v34, %v258_v31  ;;  %1098 = vmatpush3.bf16.msra.mxu1 %v1169_v50  ;;  %v1162_v50 = vld [vmem:[#allocation3 + $0x10] sm:$0xff]  }
 0x14a   :  { %1099 = vmatprep.subr.bf16.mxu1 %v1170_v51 }
 0x14b   :  { %1051 = vmatprep.mubr.bf16.mxu1 %v307_v35 }
 0x14c   :  { %1052 = vmatmul.mubr.bf16.gmra.mrb[4].mxu1 %v308_v33 }
 0x14d   :  { %v1025_v36 = vpop.f32.mrb[8].mxu0  ;;  %1100 = vmatpush3.bf16.msra.mxu1 %v1170_v51  ;;  %v1163_v51 = vld [vmem:[#allocation3 + $0x18] sm:$0xff]  }
 0x14e   :  { %v274_v37 = vpop.f32.mrb[9].mxu0  ;;  %1101 = vmatprep.subr.bf16.mxu1 %v1171_v52 }
 0x14f   :  { %v1026_v38 = vpop.f32.mrb[10].mxu0 }
 0x150   :  { %v310_v39 = vpack.c.bf16 %v1026_v38, %v1025_v36  ;;  %v277_v40 = vpop.f32.mrb[11].mxu0 }
 0x151   :  { %v309_v41 = vpack.c.bf16 %v277_v40, %v274_v37  ;;  %1102 = vmatpush3.bf16.msra.mxu1 %v1171_v52  ;;  %v1164_v52 = vld [vmem:[#allocation3 + $0x20] sm:$0xff]  }
 0x152   :  { %1103 = vmatprep.subr.bf16.mxu1 %v1172_v53 }
 0x153   :  { %1055 = vmatprep.mubr.bf16.mxu1 %v309_v41 }
 0x154   :  { %1056 = vmatmul.mubr.bf16.gmra.mrb[8].mxu1 %v310_v39 }
 0x155   :  { %v1029_v42 = vpop.f32.mrb[12].mxu0  ;;  %1104 = vmatpush3.bf16.msra.mxu1 %v1172_v53  ;;  %v1165_v53 = vld [vmem:[#allocation3 + $0x28] sm:$0xff]  }
 0x156   :  { %v290_v43 = vpop.f32.mrb[13].mxu0  ;;  %1105 = vmatprep.subr.bf16.mxu1 %v1173_v54 }
 0x157   :  { %v1030_v44 = vpop.f32.mrb[14].mxu0 }
 0x158   :  { %v312_v45 = vpack.c.bf16 %v1030_v44, %v1029_v42  ;;  %v293_v46 = vpop.f32.mrb[15].mxu0 }
 0x159   :  { %v311_v47 = vpack.c.bf16 %v293_v46, %v290_v43  ;;  %1106 = vmatpush3.bf16.msra.mxu1 %v1173_v54  ;;  %v1166_v54 = vld [vmem:[#allocation3 + $0x30] sm:$0xff]  }
 0x15a   :  { %1107 = vmatprep.subr.bf16.mxu1 %v1174_v55 }
 0x15b   :  { %1059 = vmatprep.mubr.bf16.mxu1 %v311_v47 }
 0x15c   :  { %1060 = vmatmul.mubr.bf16.gmra.mrb[12].mxu1 %v312_v45 }
 0x15d   :  { %1108 = vmatpush3.bf16.msra.mxu1 %v1174_v55  ;;  %v1167_v55 = vld [vmem:[#allocation3 + $0x38] sm:$0xff]  }
 0x217   :  { %v1049_v57 = vpop.f32.mrb[0].mxu1 }
 0x218   :  { %v427_v58 = vadd.f32 %v1049_v57, %v909_v56  ;;  %v418_v59 = vpop.f32.mrb[1].mxu1 }
 0x219   :  { %v419_v60 = vadd.f32 %v909_v56, %v418_v59  ;;  %v1050_v61 = vpop.f32.mrb[2].mxu1 }
 0x21a   :  { %v430_v62 = vadd.f32 %v1050_v61, %v909_v56  ;;  %v421_v63 = vpop.f32.mrb[3].mxu1  ;;  %v483_v1 = vmax.f32 %v427_v58, 0.0 }
 0x21b   :  { %v422_v0 = vadd.f32 %v909_v56, %v421_v63  ;;  %v481_v3 = vmax.f32 %v419_v60, 0.0 }
 0x21c   :  { %v484_v2 = vmax.f32 %v430_v62, 0.0 }
 0x21d   :  { %v482_v4 = vmax.f32 %v422_v0, 0.0 }
 0x21e   :  { %v498_v5 = vpack.c.bf16 %v484_v2, %v483_v1 }
 0x21f   :  { %v497_v6 = vpack.c.bf16 %v482_v4, %v481_v3  ;;  %v1053_v7 = vpop.f32.mrb[4].mxu1 }
 0x220   :  { %v443_v8 = vadd.f32 %v1053_v7, %v909_v56  ;;  %v434_v9 = vpop.f32.mrb[5].mxu1 }
 0x221   :  { %v435_v10 = vadd.f32 %v909_v56, %v434_v9  ;;  %v1054_v11 = vpop.f32.mrb[6].mxu1  ;;  %1063 = vmatprep.subr.bf16.mxu0 %v497_v6 }
 0x222   :  { %v446_v12 = vadd.f32 %v1054_v11, %v909_v56  ;;  %v437_v13 = vpop.f32.mrb[7].mxu1  ;;  %1064 = vmatpush3.bf16.msra.mxu0 %v497_v6  ;;  %v487_v15 = vmax.f32 %v443_v8, 0.0 }
 0x223   :  { %v438_v14 = vadd.f32 %v909_v56, %v437_v13  ;;  %1065 = vmatprep.subr.bf16.mxu0 %v498_v5  ;;  %v485_v17 = vmax.f32 %v435_v10, 0.0 }
 0x224   :  { %v488_v16 = vmax.f32 %v446_v12, 0.0 }
 0x225   :  { %v486_v18 = vmax.f32 %v438_v14, 0.0 }
 0x226   :  { %v500_v19 = vpack.c.bf16 %v488_v16, %v487_v15  ;;  %1066 = vmatpush3.bf16.msra.mxu0 %v498_v5 }
 0x227   :  { %v499_v20 = vpack.c.bf16 %v486_v18, %v485_v17  ;;  %v1057_v21 = vpop.f32.mrb[8].mxu1  ;;  %v926_v17 = vld [vmem:[%s1435_s5] ss:$0 sm:$0xff]  ;;  %s1300_s5 = smov [#allocation11]  }
 0x228   :  { %v459_v22 = vadd.f32 %v1057_v21, %v909_v56  ;;  %v450_v23 = vpop.f32.mrb[9].mxu1  ;;  %s879_s21 = sshll.u32 %s1300_s5, 4  ;;  %s880_s21 = int_to_ptr.vmem [resolvable:$true] %s879_s21 }
 0x229   :  { %v451_v24 = vadd.f32 %v909_v56, %v450_v23  ;;  %v1058_v25 = vpop.f32.mrb[10].mxu1  ;;  %1067 = vmatprep.subr.bf16.mxu0 %v499_v20  ;;  %s1264_s22 = scalar_lea.vmem %s880_s21, 2048  ;;  %p1269_p5 = scmp.lt.s32.totalorder %s880_s21, %s880_s21 }
 0x22a   :  { %v462_v26 = vadd.f32 %v1058_v25, %v909_v56  ;;  %v453_v27 = vpop.f32.mrb[11].mxu1  ;;  %1068 = vmatpush3.bf16.msra.mxu0 %v499_v20  ;;  %v491_v29 = vmax.f32 %v459_v22, 0.0  ;;  %p1265_p4 = scmp.ne.s32.totalorder %s880_s21, %s1264_s22  ;;  %p1270_p6 = scmp.lt.s32.totalorder %s1264_s22, %s1264_s22 }
 0x22b   :  { %v454_v28 = vadd.f32 %v909_v56, %v453_v27  ;;  %1069 = vmatprep.subr.bf16.mxu0 %v500_v19  ;;  %v489_v31 = vmax.f32 %v451_v24, 0.0 }
 0x22c   :  { %v492_v30 = vmax.f32 %v462_v26, 0.0  ;;  %p1271_p7 = por %p1270_p6, %p1269_p5 }
 0x22d   :  { %v490_v32 = vmax.f32 %v454_v28, 0.0 }
 0x22e   :  { %v502_v33 = vpack.c.bf16 %v492_v30, %v491_v29  ;;  %1070 = vmatpush3.bf16.msra.mxu0 %v500_v19  ;;  %p1272_p8 = pnand %p1271_p7, %p1265_p4 }
 0x22f   :  { %v501_v34 = vpack.c.bf16 %v490_v32, %v489_v31  ;;  %v1061_v35 = vpop.f32.mrb[12].mxu1 }
 0x230   :  { %v475_v36 = vadd.f32 %v1061_v35, %v909_v56  ;;  %v466_v37 = vpop.f32.mrb[13].mxu1 }
 0x231   :  { %v467_v38 = vadd.f32 %v909_v56, %v466_v37  ;;  %v1062_v39 = vpop.f32.mrb[14].mxu1  ;;  %1071 = vmatprep.subr.bf16.mxu0 %v501_v34 }
 0x232   :  { %v478_v40 = vadd.f32 %v1062_v39, %v909_v56  ;;  %v469_v41 = vpop.f32.mrb[15].mxu1  ;;  %1072 = vmatpush3.bf16.msra.mxu0 %v501_v34  ;;  %v495_v43 = vmax.f32 %v475_v36, 0.0 }
 0x233   :  { %v470_v42 = vadd.f32 %v909_v56, %v469_v41  ;;  %1073 = vmatprep.subr.bf16.mxu0 %v502_v33  ;;  %v493_v45 = vmax.f32 %v467_v38, 0.0  ;;  %v1175_v56 = vld [vmem:[#allocation9 + $0x38] sm:$0xff]  }
 0x234   :  { %v496_v44 = vmax.f32 %v478_v40, 0.0  ;;  %1109 = vmatprep.subr.bf16.mxu1 %v1175_v56 }
 0x235   :  { %v494_v46 = vmax.f32 %v470_v42, 0.0  ;;  %1110 = vmatpush3.bf16.msra.mxu1 %v1175_v56 }
 0x236   :  { %v504_v47 = vpack.c.bf16 %v496_v44, %v495_v43  ;;  %1074 = vmatpush3.bf16.msra.mxu0 %v502_v33 }
 0x237   :  { %v503_v48 = vpack.c.bf16 %v494_v46, %v493_v45 }
 0x239   :  { %1075 = vmatprep.subr.bf16.mxu0 %v503_v48 }
 0x23a   :  { %1076 = vmatpush3.bf16.msra.mxu0 %v503_v48 }
 0x23b   :  { %1077 = vmatprep.subr.bf16.mxu0 %v504_v47 }
 0x23e   :  { %1078 = vmatpush3.bf16.msra.mxu0 %v504_v47 }
 0x241   :  { %1080 = vmatmul.mubr.bf16.vlgmr.msra.gmra.mrb[16].mxu0 %v1161_v49 }
 0x242   :  { %1083 = vmatprep.mubr.bf16.mxu0 %v1162_v50 }
 0x249   :  { %1084 = vmatmul.mubr.bf16.gmra.mrb[20].mxu0 %v1163_v51 }
 0x24a   :  { %1087 = vmatprep.mubr.bf16.mxu0 %v1164_v52 }
 0x251   :  { %1088 = vmatmul.mubr.bf16.gmra.mrb[24].mxu0 %v1165_v53 }
 0x252   :  { %1091 = vmatprep.mubr.bf16.mxu0 %v1166_v54 }
 0x259   :  { %1092 = vmatmul.mubr.bf16.gmra.mrb[28].mxu0 %v1167_v55 }
 0x314   :  { %v1081_v57 = vpop.f32.mrb[16].mxu0 }
 0x315   :  { %v619_v58 = vpop.f32.mrb[17].mxu0 }
 0x316   :  { %v1082_v59 = vpop.f32.mrb[18].mxu0 }
 0x317   :  { %v683_v60 = vpack.c.bf16 %v1082_v59, %v1081_v57  ;;  %v622_v61 = vpop.f32.mrb[19].mxu0 }
 0x318   :  { %v682_v62 = vpack.c.bf16 %v622_v61, %v619_v58 }
 0x31a   :  { %1111 = vmatprep.mubr.bf16.mxu1 %v682_v62 }
 0x31b   :  { %1112 = vmatmul.mubr.bf16.vlgmr.msra.gmra.mrb[16].mxu1 %v683_v60 }
 0x31c   :  { %v1085_v63 = vpop.f32.mrb[20].mxu0 }
 0x31d   :  { %v635_v0 = vpop.f32.mrb[21].mxu0 }
 0x31e   :  { %v1086_v1 = vpop.f32.mrb[22].mxu0 }
 0x31f   :  { %v685_v2 = vpack.c.bf16 %v1086_v1, %v1085_v63  ;;  %v638_v3 = vpop.f32.mrb[23].mxu0 }
 0x320   :  { %v684_v4 = vpack.c.bf16 %v638_v3, %v635_v0 }
 0x322   :  { %1115 = vmatprep.mubr.bf16.mxu1 %v684_v4 }
 0x323   :  { %1116 = vmatmul.mubr.bf16.gmra.mrb[20].mxu1 %v685_v2 }
 0x324   :  { %v1089_v5 = vpop.f32.mrb[24].mxu0 }
 0x325   :  { %v651_v6 = vpop.f32.mrb[25].mxu0 }
 0x326   :  { %v1090_v7 = vpop.f32.mrb[26].mxu0 }
 0x327   :  { %v687_v8 = vpack.c.bf16 %v1090_v7, %v1089_v5  ;;  %v654_v9 = vpop.f32.mrb[27].mxu0 }
 0x328   :  { %v686_v10 = vpack.c.bf16 %v654_v9, %v651_v6 }
 0x32a   :  { %1119 = vmatprep.mubr.bf16.mxu1 %v686_v10 }
 0x32b   :  { %1120 = vmatmul.mubr.bf16.gmra.mrb[24].mxu1 %v687_v8 }
 0x32c   :  { %v1093_v11 = vpop.f32.mrb[28].mxu0 }
 0x32d   :  { %v667_v12 = vpop.f32.mrb[29].mxu0 }
 0x32e   :  { %v1094_v13 = vpop.f32.mrb[30].mxu0 }
 0x32f   :  { %v689_v14 = vpack.c.bf16 %v1094_v13, %v1093_v11  ;;  %v670_v15 = vpop.f32.mrb[31].mxu0 }
 0x330   :  { %v688_v16 = vpack.c.bf16 %v670_v15, %v667_v12 }
 0x332   :  { %1123 = vmatprep.mubr.bf16.mxu1 %v688_v16 }
 0x333   :  { %1124 = vmatmul.mubr.bf16.gmra.mrb[28].mxu1 %v689_v14 }
 0x3ee   :  { %v1113_v18 = vpop.f32.mrb[16].mxu1 }
 0x3ef   :  { %v804_v19 = vadd.f32 %v1113_v18, %v926_v17  ;;  %v795_v20 = vpop.f32.mrb[17].mxu1 }
 0x3f0   :  { %v796_v21 = vadd.f32 %v926_v17, %v795_v20  ;;  %v1114_v22 = vpop.f32.mrb[18].mxu1 }
 0x3f1   :  { %860 = vst [vmem:[#allocation11 + $0x10] sm:$0xff] %v804_v19  ;;  %v807_v23 = vadd.f32 %v1114_v22, %v926_v17  ;;  %v798_v24 = vpop.f32.mrb[19].mxu1 }
 0x3f2   :  { %858 = vst [vmem:[#allocation11] sm:$0xff] %v796_v21  ;;  %v799_v25 = vadd.f32 %v926_v17, %v798_v24 }
 0x3f3   :  { %861 = vst [vmem:[#allocation11 + $0x18] sm:$0xff] %v807_v23 }
 0x3f4   :  { %859 = vst [vmem:[#allocation11 + $0x8] sm:$0xff] %v799_v25 }
 0x3f6   :  { %v1117_v26 = vpop.f32.mrb[20].mxu1 }
 0x3f7   :  { %v820_v27 = vadd.f32 %v1117_v26, %v926_v17  ;;  %v811_v28 = vpop.f32.mrb[21].mxu1 }
 0x3f8   :  { %v812_v29 = vadd.f32 %v926_v17, %v811_v28  ;;  %v1118_v30 = vpop.f32.mrb[22].mxu1 }
 0x3f9   :  { %864 = vst [vmem:[#allocation11 + $0x30] sm:$0xff] %v820_v27  ;;  %v823_v31 = vadd.f32 %v1118_v30, %v926_v17  ;;  %v814_v32 = vpop.f32.mrb[23].mxu1 }
 0x3fa   :  { %862 = vst [vmem:[#allocation11 + $0x20] sm:$0xff] %v812_v29  ;;  %v815_v33 = vadd.f32 %v926_v17, %v814_v32 }
 0x3fb   :  { %865 = vst [vmem:[#allocation11 + $0x38] sm:$0xff] %v823_v31 }
 0x3fc   :  { %863 = vst [vmem:[#allocation11 + $0x28] sm:$0xff] %v815_v33 }
 0x3fe   :  { %v1121_v34 = vpop.f32.mrb[24].mxu1 }
 0x3ff   :  { %v836_v35 = vadd.f32 %v1121_v34, %v926_v17  ;;  %v827_v36 = vpop.f32.mrb[25].mxu1 }
 0x400   :  { %v828_v37 = vadd.f32 %v926_v17, %v827_v36  ;;  %v1122_v38 = vpop.f32.mrb[26].mxu1 }
 0x401   :  { %868 = vst [vmem:[#allocation11 + $0x50] sm:$0xff] %v836_v35  ;;  %v839_v39 = vadd.f32 %v1122_v38, %v926_v17  ;;  %v830_v40 = vpop.f32.mrb[27].mxu1 }
 0x402   :  { %866 = vst [vmem:[#allocation11 + $0x40] sm:$0xff] %v828_v37  ;;  %v831_v41 = vadd.f32 %v926_v17, %v830_v40 }
 0x403   :  { %869 = vst [vmem:[#allocation11 + $0x58] sm:$0xff] %v839_v39 }
 0x404   :  { %867 = vst [vmem:[#allocation11 + $0x48] sm:$0xff] %v831_v41 }
 0x406   :  { %v1125_v42 = vpop.f32.mrb[28].mxu1 }
 0x407   :  { %v852_v43 = vadd.f32 %v1125_v42, %v926_v17  ;;  %v843_v44 = vpop.f32.mrb[29].mxu1 }
 0x408   :  { %v844_v45 = vadd.f32 %v926_v17, %v843_v44  ;;  %v1126_v46 = vpop.f32.mrb[30].mxu1 }
 0x409   :  { %872 = vst [vmem:[#allocation11 + $0x70] sm:$0xff] %v852_v43  ;;  %v855_v47 = vadd.f32 %v1126_v46, %v926_v17  ;;  %v846_v48 = vpop.f32.mrb[31].mxu1 }
 0x40a   :  { %870 = vst [vmem:[#allocation11 + $0x60] sm:$0xff] %v844_v45  ;;  %v847_v49 = vadd.f32 %v926_v17, %v846_v48 }
 0x40b   :  { %873 = vst [vmem:[#allocation11 + $0x78] sm:$0xff] %v855_v47 }
 0x40c   :  { %871 = vst [vmem:[#allocation11 + $0x68] sm:$0xff] %v847_v49 }
 0x40d   :  { %1275 = shalt.err (!%p1272_p8)
}
 0x40e   :  { %s1276_s26 = scalar_lea.hbm %s1436_s6, 2048 }
 0x40f   :  { %p1277_p9 = scmp.ne.s32.totalorder %s1436_s6, %s1276_s26  ;;  %p1280_p10 = scmp.lt.u32.totalorder %s1276_s26, %s1436_s6 }
 0x411   :  { %p1282_p11 = pnand %p1280_p10, %p1277_p9 }
 0x413   :  { %1285 = shalt.err (!%p1282_p11)
}
 0x414   :  { %s1301_s7 = smov 128   ;;  %s1302_s8 = smov 8  }
 0x415   :  { %885 = dma.vmem_to_hbm [thread:$0]  %s880_s21, 2048, %s1436_s6, [#allocation5], %s1301_s7, %s1301_s7, %s1302_s8  }
 0x416   :  { %1292 = dma.done.wait [#allocation5], 2048  }
 0x417   :  { %1293 = vsyncadd [#allocation5], 4294965248 }
 0x418   :  { %889 = vsyncpa [#allocation4], 1 }
 0x419   :  { %890 = vsyncpa [#allocation7], 1 }
 0x41a   :  { %891 = vsyncpa [#allocation10], 1 }
 0x41b   :  { %892 = vsyncpa [#allocation5], 1 }

</bundles_post_ra>
